<compile_context>
chip_gen: v6e
topology: v6e:2x2x1
jax: 0.10.0
libtpu: 0.0.40
codegen_flags: <defaults>
</compile_context>

<pallas_src>
import functools

import jax
import jax.numpy as jnp
from jax.experimental import pallas as pl
from jax.experimental.pallas import tpu as pltpu


def _gen_mlp_kernel(x_ref, w1_ref, b1_ref, w2_ref, b2_ref, o_ref):
    # x arrives f32 (single HBM pass); cast to bf16 on the VPU (free slot in a
    # memory-bound kernel) right before feeding the MXU.
    x_bf = x_ref[...].astype(jnp.bfloat16)
    # h = relu(x @ W1 + b1)   (bf16 operands, f32 MXU accumulation)
    h = jnp.dot(x_bf, w1_ref[...], preferred_element_type=jnp.float32)
    h = jnp.maximum(h + b1_ref[...], 0.0)          # b1 is (1, H): broadcasts over rows
    # y = tanh(h @ W2 + b2)
    y = jnp.dot(h.astype(jnp.bfloat16), w2_ref[...],
                preferred_element_type=jnp.float32)
    o_ref[...] = jnp.tanh(y + b2_ref[...]).astype(o_ref.dtype)   # bf16 store


def _pick_batch_tile(B, batch_tile):
    """Pick the batch tile: >=2 tiles whenever B > 8 (so v7x's two TensorCores
    both get work), sublane-aligned (multiple of 8) whenever the tile is not
    the full batch dim (the (8,128) BlockSpec rule)."""
    if B <= 8:
        return B                                   # full-dim block: always legal
    half = (-(-B // 2) + 7) // 8 * 8               # round_up(cdiv(B, 2), 8)
    tb = min(batch_tile, half)
    return B if tb >= B else tb


@functools.partial(jax.jit, static_argnames=("img_shape", "batch_tile"))
def gan_generator_forward(x_nchw, w1_bf, b1, w2_bf, b2, *,
                          img_shape, batch_tile=1024):
    """Fused generator forward: tanh(relu(x @ W1 + b1) @ W2 + b2), NCHW in/out.

    x_nchw: (B, C, H, W) f32.  w1_bf: (F, Hd) bf16, w2_bf: (Hd, F) bf16,
    biases f32 (added to the f32 MXU accumulators).  Output is bf16.
    """
    C, Himg, Wimg = img_shape
    B = x_nchw.shape[0]
    F = C * Himg * Wimg
    H = w1_bf.shape[1]
    O = w2_bf.shape[1]

    x_flat = x_nchw.reshape(B, F).astype(jnp.float32)
    b1_f32 = b1.reshape(1, H).astype(jnp.float32)
    b2_f32 = b2.reshape(1, O).astype(jnp.float32)

    TB = _pick_batch_tile(B, batch_tile)
    # No padding: Pallas pads the partial last block internally and masks its
    # writeback, so out-of-range rows are never stored.
    grid = (pl.cdiv(B, TB),)

    cost = pl.CostEstimate(
        flops=2 * B * F * H + 2 * B * H * O,
        transcendentals=B * O,
        bytes_accessed=(B * F * 4                 # x (f32, cast in-kernel)
                        + F * H * 2 + H * O * 2   # weights (bf16), VMEM-resident
                        + H * 4 + O * 4           # biases (f32)
                        + B * O * 2),             # output (bf16)
    )

    y_flat = pl.pallas_call(
        _gen_mlp_kernel,
        out_shape=jax.ShapeDtypeStruct((B, O), jnp.bfloat16),
        grid_spec=pltpu.PrefetchScalarGridSpec(
            num_scalar_prefetch=0,
            grid=grid,
            in_specs=[
                # Activations: stream one batch tile per grid step.
                pl.BlockSpec((TB, F), lambda i: (i, 0)),
                # Weights / biases: grid-invariant block index -> VMEM-resident,
                # DMA'd once.  (pipeline_mode=pl.Buffered(1) would shave ~0.5 MiB
                # more VMEM; unnecessary at this footprint vs the 32 MiB limit.)
                pl.BlockSpec((F, H), lambda i: (0, 0)),
                pl.BlockSpec((1, H), lambda i: (0, 0)),
                pl.BlockSpec((H, O), lambda i: (0, 0)),
                pl.BlockSpec((1, O), lambda i: (0, 0)),
            ],
            out_specs=pl.BlockSpec((TB, O), lambda i: (i, 0)),
        ),
        compiler_params=pltpu.CompilerParams(
            # Batch tiles are independent.
            # TODO(synk): on v7x, pltpu.CORE_PARALLEL would explicitly shard this
            # axis across the two TensorCores; PARALLEL kept for cross-generation
            # portability.
            dimension_semantics=(pltpu.PARALLEL,),
            vmem_limit_bytes=32 * 1024 * 1024,
        ),
        cost_estimate=cost,
    )(x_flat, w1_bf, b1_f32, w2_bf, b2_f32)

    # Output stays bf16 (tanh range [-1, 1]); cast outside only if a consumer
    # truly needs f32 — intentional accuracy/bandwidth trade per review.
    return y_flat.reshape(B, C, Himg, Wimg)


class GanModelPallas:
    """JAX/Pallas equivalent of GanModel: forward(x) -> gen(x)."""

    def __init__(self, key, img_shape=(4, 16, 16), hidden=128):
        C, Himg, Wimg = img_shape
        F = C * Himg * Wimg
        k1, k2, k3, k4 = jax.random.split(key, 4)
        scale1 = 1.0 / jnp.sqrt(F)
        scale2 = 1.0 / jnp.sqrt(hidden)
        self.img_shape = img_shape
        # f32 master weights (used by the reference); bf16 device-resident copies
        # feed the kernel so no per-call re-cast / re-upload happens.
        # (bf16 weights + bf16 output are an intentional accuracy trade.)
        self.w1 = jax.random.uniform(k1, (F, hidden), jnp.float32, -scale1, scale1)
        self.b1 = jax.random.uniform(k2, (hidden,), jnp.float32, -scale1, scale1)
        self.w2 = jax.random.uniform(k3, (hidden, F), jnp.float32, -scale2, scale2)
        self.b2 = jax.random.uniform(k4, (F,), jnp.float32, -scale2, scale2)
        self.w1_bf = self.w1.astype(jnp.bfloat16)
        self.w2_bf = self.w2.astype(jnp.bfloat16)
        # TODO(synk): the discriminator / training loop (train, sampleX, Adam
        # updates) involve autograd + optimizer state and are out of scope for
        # a forward-pass kernel; only forward() is implemented here.

    def forward(self, x_nchw):
        return gan_generator_forward(x_nchw, self.w1_bf, self.b1,
                                     self.w2_bf, self.b2,
                                     img_shape=self.img_shape)

    def __call__(self, x):
        return self.forward(x)


def _reference_forward(model, x_nchw):
    """Pure-JAX f32 reference (bf16 weights/output loosen tolerance to ~1e-2)."""
    B = x_nchw.shape[0]
    C, Himg, Wimg = model.img_shape
    x = x_nchw.reshape(B, -1)
    h = jnp.maximum(x @ model.w1 + model.b1, 0.0)
    y = jnp.tanh(h @ model.w2 + model.b2)
    return y.reshape(B, C, Himg, Wimg)


if __name__ == "__main__":
    key = jax.random.PRNGKey(0)
    kparam, kx = jax.random.split(key)

    model = GanModelPallas(kparam, img_shape=(4, 16, 16), hidden=128)

    # Small deterministic input, NCHW like PyTorch: batch=2, channels=4, 16x16.
    x = jax.random.normal(kx, (2, 4, 16, 16), dtype=jnp.float32)

    out = model(x)
    out = jax.block_until_ready(out)

    ref = _reference_forward(model, x)
    assert out.shape == (2, 4, 16, 16)
    assert out.dtype == jnp.bfloat16
    # bf16 weights + f32 accumulation + bf16 output: matches the f32 reference
    # to ~1e-2 (documented, intentional accuracy/bandwidth trade).
    assert jnp.allclose(out.astype(jnp.float32), ref, atol=2e-2, rtol=2e-2)

    print("KERNEL_OK")
</pallas_src>

<mosaic_0001>
module attributes {stable_mosaic.version = 11 : i64} {
  func.func @_gen_mlp_kernel(%arg0: i32, %arg1: memref<2x1024xf32, #tpu.memory_space<vmem>>, %arg2: memref<1024x128xbf16, #tpu.memory_space<vmem>>, %arg3: memref<1x128xf32, #tpu.memory_space<vmem>>, %arg4: memref<128x1024xbf16, #tpu.memory_space<vmem>>, %arg5: memref<1x1024xf32, #tpu.memory_space<vmem>>, %arg6: memref<2x1024xbf16, #tpu.memory_space<vmem>>) attributes {dimension_semantics = [#tpu.dimension_semantics<parallel>], iteration_bounds = array<i64: 1>, scalar_prefetch = 0 : i64, scratch_operands = 0 : i64, tpu.core_type = #tpu.core_type<tc>, window_params = [{transform_indices = @transform_0, window_bounds = array<i64: 2, 1024>}, {pipeline_mode = #tpu.pipeline_mode<synchronous>, transform_indices = @transform_1, window_bounds = array<i64: 1024, 128>}, {pipeline_mode = #tpu.pipeline_mode<synchronous>, transform_indices = @transform_2, window_bounds = array<i64: 1, 128>}, {pipeline_mode = #tpu.pipeline_mode<synchronous>, transform_indices = @transform_3, window_bounds = array<i64: 128, 1024>}, {pipeline_mode = #tpu.pipeline_mode<synchronous>, transform_indices = @transform_4, window_bounds = array<i64: 1, 1024>}, {transform_indices = @transform_5, window_bounds = array<i64: 2, 1024>}]} {
    %c0 = arith.constant 0 : index
    %c0_0 = arith.constant 0 : index
    %0 = vector.load %arg1[%c0, %c0_0] : memref<2x1024xf32, #tpu.memory_space<vmem>>, vector<2x1024xf32>
    %1 = arith.truncf %0 : vector<2x1024xf32> to vector<2x1024xbf16>
    %c0_1 = arith.constant 0 : index
    %c0_2 = arith.constant 0 : index
    %2 = vector.load %arg2[%c0_1, %c0_2] : memref<1024x128xbf16, #tpu.memory_space<vmem>>, vector<1024x128xbf16>
    %cst = arith.constant dense<0.000000e+00> : vector<2x128xf32>
    %3 = tpu.matmul %1, %2, %cst {dimension_numbers = #tpu.dot_dimension_numbers<[1], [0], [0], [1], [0, 0, 1, 1], [], []>} : vector<2x1024xbf16>, vector<1024x128xbf16>, vector<2x128xf32> -> vector<2x128xf32>
    %c0_3 = arith.constant 0 : index
    %c0_4 = arith.constant 0 : index
    %4 = vector.load %arg3[%c0_3, %c0_4] : memref<1x128xf32, #tpu.memory_space<vmem>>, vector<1x128xf32>
    %5 = vector.broadcast %4 : vector<1x128xf32> to vector<2x128xf32>
    %6 = arith.addf %3, %5 : vector<2x128xf32>
    %cst_5 = arith.constant 0.000000e+00 : f32
    %7 = vector.broadcast %cst_5 : f32 to vector<2x128xf32>
    %8 = arith.maximumf %6, %7 : vector<2x128xf32>
    %9 = arith.truncf %8 : vector<2x128xf32> to vector<2x128xbf16>
    %c0_6 = arith.constant 0 : index
    %c0_7 = arith.constant 0 : index
    %10 = vector.load %arg4[%c0_6, %c0_7] : memref<128x1024xbf16, #tpu.memory_space<vmem>>, vector<128x1024xbf16>
    %cst_8 = arith.constant dense<0.000000e+00> : vector<2x1024xf32>
    %11 = tpu.matmul %9, %10, %cst_8 {dimension_numbers = #tpu.dot_dimension_numbers<[1], [0], [0], [1], [0, 0, 1, 1], [], []>} : vector<2x128xbf16>, vector<128x1024xbf16>, vector<2x1024xf32> -> vector<2x1024xf32>
    %c0_9 = arith.constant 0 : index
    %c0_10 = arith.constant 0 : index
    %12 = vector.load %arg5[%c0_9, %c0_10] : memref<1x1024xf32, #tpu.memory_space<vmem>>, vector<1x1024xf32>
    %13 = vector.broadcast %12 : vector<1x1024xf32> to vector<2x1024xf32>
    %14 = arith.addf %11, %13 : vector<2x1024xf32>
    %15 = math.tanh %14 : vector<2x1024xf32>
    %16 = arith.truncf %15 : vector<2x1024xf32> to vector<2x1024xbf16>
    %c0_11 = arith.constant 0 : index
    %c0_12 = arith.constant 0 : index
    %17 = vector.load %arg6[%c0_11, %c0_12] : memref<2x1024xbf16, #tpu.memory_space<vmem>>, vector<2x1024xbf16>
    tpu.vector_store %arg6[%c0_11, %c0_12], %16 {strides = array<i32>} : memref<2x1024xbf16, #tpu.memory_space<vmem>>, vector<2x1024xbf16>,
    return
  }
  func.func @transform_0(%arg0: i32) -> (i32, i32) {
    %c0_i32 = arith.constant 0 : i32
    %c0_i32_0 = arith.constant 0 : i32
    return %arg0, %c0_i32 : i32, i32
  }
  func.func @transform_1(%arg0: i32) -> (i32, i32) {
    %c0_i32 = arith.constant 0 : i32
    %c0_i32_0 = arith.constant 0 : i32
    %c0_i32_1 = arith.constant 0 : i32
    return %c0_i32, %c0_i32_0 : i32, i32
  }
  func.func @transform_2(%arg0: i32) -> (i32, i32) {
    %c0_i32 = arith.constant 0 : i32
    %c0_i32_0 = arith.constant 0 : i32
    %c0_i32_1 = arith.constant 0 : i32
    return %c0_i32, %c0_i32_0 : i32, i32
  }
  func.func @transform_3(%arg0: i32) -> (i32, i32) {
    %c0_i32 = arith.constant 0 : i32
    %c0_i32_0 = arith.constant 0 : i32
    %c0_i32_1 = arith.constant 0 : i32
    return %c0_i32, %c0_i32_0 : i32, i32
  }
  func.func @transform_4(%arg0: i32) -> (i32, i32) {
    %c0_i32 = arith.constant 0 : i32
    %c0_i32_0 = arith.constant 0 : i32
    %c0_i32_1 = arith.constant 0 : i32
    return %c0_i32, %c0_i32_0 : i32, i32
  }
  func.func @transform_5(%arg0: i32) -> (i32, i32) {
    %c0_i32 = arith.constant 0 : i32
    %c0_i32_0 = arith.constant 0 : i32
    return %arg0, %c0_i32 : i32, i32
  }
}

</mosaic_0001>

<bundles_post_ra>
// kernel: gan_generator_forward.1
= control target key start
LH: loop header
LB: loop body
LE: loop exit
PB: predicated region body
PF: predicated region fallthrough
CT: control target
= control target key end

     0   :  { %10 = vsyncpa [#allocation3], 0  ;;  %s1895_s0 = inlined_call_operand.vmem [shape: f32[2,1024], index: 0, kind: input, shape index: {}]   ;;  %s1896_s1 = inlined_call_operand.hbm [shape: bf16[1024,128], index: 1, kind: input, shape index: {}]   ;;  %s1897_s2 = inlined_call_operand.vmem [shape: f32[1,128], index: 2, kind: input, shape index: {}]   ;;  %s1898_s3 = inlined_call_operand.hbm [shape: bf16[128,1024], index: 3, kind: input, shape index: {}]   ;;  %s1899_s4 = inlined_call_operand.vmem [shape: f32[1,1024], index: 4, kind: input, shape index: {}]   ;;  %s1900_s5 = inlined_call_operand.vmem [shape: bf16[2,1024], index: 5, kind: output, shape index: {}]  }
   0x1   :  { %11 = vsyncpa [#allocation5], 0  ;;  %s1811_s18 = smov [#allocation2]  }
   0x2   :  { %s19_s19 = sshll.u32 %s1811_s18, 4  ;;  %s20_s19 = int_to_ptr.vmem [resolvable:$true] %s19_s19 }
   0x3   :  { %s1775_s20 = scalar_lea.vmem %s20_s19, 8192  ;;  %p1780_p1 = scmp.lt.s32.totalorder %s20_s19, %s20_s19 }
   0x4   :  { %p1776_p0 = scmp.ne.s32.totalorder %s20_s19, %s1775_s20  ;;  %p1781_p2 = scmp.lt.s32.totalorder %s1775_s20, %s1775_s20 }
   0x6   :  { %p1782_p3 = por %p1781_p2, %p1780_p1 }
   0x8   :  { %p1783_p4 = pnand %p1782_p3, %p1776_p0 }
   0xa   :  { %1786 = shalt.err (!%p1783_p4)
}
   0xb   :  { %s1812_s21 = smov 64   ;;  %s1813_s22 = smov 4  }
   0xc   :  { %25 = dma.hbm_to_vmem [thread:$0]  %s1896_s1, 8192, %s20_s19, [#allocation3], %s1812_s21, %s1812_s21, %s1813_s22  }
   0xd   :  { %s1814_s25 = smov [#allocation4]  }
   0xe   :  { %s33_s26 = sshll.u32 %s1814_s25, 4  ;;  %s34_s26 = int_to_ptr.vmem [resolvable:$true] %s33_s26 }
   0xf   :  { %s1795_s27 = scalar_lea.vmem %s34_s26, 8192  ;;  %p1800_p6 = scmp.lt.s32.totalorder %s34_s26, %s34_s26 }
  0x10   :  { %p1796_p5 = scmp.ne.s32.totalorder %s34_s26, %s1795_s27  ;;  %p1801_p7 = scmp.lt.s32.totalorder %s1795_s27, %s1795_s27 }
  0x12   :  { %p1802_p8 = por %p1801_p7, %p1800_p6 }
  0x14   :  { %p1803_p9 = pnand %p1802_p8, %p1796_p5 }
  0x16   :  { %1806 = shalt.err (!%p1803_p9)
}
  0x17   :  { %s1815_s28 = smov 512   ;;  %s1816_s29 = smov 32  }
  0x18   :  { %39 = dma.hbm_to_vmem [thread:$0]  %s1898_s3, 8192, %s34_s26, [#allocation5], %s1815_s28, %s1815_s28, %s1816_s29  }
  0x19   :  { %1807 = dma.done.wait [#allocation3], 8192  }
  0x1a   :  { %1808 = vsyncadd [#allocation3], 4294959104 }
  0x1b   :  { %1809 = dma.done.wait [#allocation5], 8192  }
  0x1c   :  { %1810 = vsyncadd [#allocation5], 4294959104  ;;  %v1685_v0 = vld [vmem:[#allocation2 + $0x78] sm:$0xff]   ;;  %v1689_v4 = vld [vmem:[#allocation2 + $0x70] sm:$0xff]   ;;  %v1817_v22 = vmov 1983009808   ;;  %v57_v24 = vlaneseq }
  0x1d   :  { %v1686_v1 = vld [vmem:[#allocation2 + $0xf8] sm:$0xff]   ;;  %1588 = vmatprep.subr.bf16.mxu0 %v1685_v0  ;;  %v1690_v5 = vld [vmem:[#allocation2 + $0xf0] sm:$0xff]   ;;  %v1693_v8 = vld [vmem:[#allocation2 + $0x68] sm:$0xff]   ;;  %v55_v23 = vunpack.c.l.s4 %v1817_v22 }
  0x1e   :  { %v1687_v2 = vld [vmem:[#allocation2 + $0x38] sm:$0xff]   ;;  %1610 = vmatprep.subr.bf16.mxu1 %v1686_v1  ;;  %v1691_v6 = vld [vmem:[#allocation2 + $0x30] sm:$0xff]   ;;  %v1694_v9 = vld [vmem:[#allocation2 + $0xe8] sm:$0xff]   ;;  %v1856_v30 = vshrl.u32 %v57_v24, 7 }
  0x1f   :  { %v1688_v3 = vld [vmem:[#allocation2 + $0xb8] sm:$0xff]   ;;  %1589 = vmatpush3.bf16.msra.mxu0 %v1687_v2  ;;  %v1692_v7 = vld [vmem:[#allocation2 + $0xb0] sm:$0xff]   ;;  %v1695_v10 = vld [vmem:[#allocation2 + $0x28] sm:$0xff]   ;;  %v56_v29 = vunpack.c.0.s8 %v55_v23 }
  0x20   :  { %1611 = vmatpush3.bf16.msra.mxu1 %v1688_v3  ;;  %1590 = vmatprep.subr.bf16.mxu0 %v1689_v4  ;;  %v1696_v11 = vld [vmem:[#allocation2 + $0xa8] sm:$0xff]   ;;  %v1697_v12 = vld [vmem:[#allocation2 + $0x60] sm:$0xff]   ;;  %v1701_v16 = vld [vmem:[#allocation2 + $0x58] sm:$0xff]  }
  0x21   :  { %1612 = vmatprep.subr.bf16.mxu1 %v1690_v5  ;;  %v1698_v13 = vld [vmem:[#allocation2 + $0xe0] sm:$0xff]   ;;  %v1702_v17 = vld [vmem:[#allocation2 + $0xd8] sm:$0xff]   ;;  %v1705_v20 = vld [vmem:[#allocation2 + $0x50] sm:$0xff]   ;;  %v1859_v35 = vsub.s32 %v56_v29, %v1856_v30 }
  0x22   :  { %v1699_v14 = vld [vmem:[#allocation2 + $0x20] sm:$0xff]   ;;  %v1703_v18 = vld [vmem:[#allocation2 + $0x18] sm:$0xff]   ;;  %v1706_v21 = vld [vmem:[#allocation2 + $0xd0] sm:$0xff]  }
  0x23   :  { %1591 = vmatpush3.bf16.msra.mxu0 %v1691_v6  ;;  %v1700_v15 = vld [vmem:[#allocation2 + $0xa0] sm:$0xff]   ;;  %v1704_v19 = vld [vmem:[#allocation2 + $0x98] sm:$0xff]   ;;  %v1707_v25 = vld [vmem:[#allocation2 + $0x10] sm:$0xff]  }
  0x24   :  { %1613 = vmatpush3.bf16.msra.mxu1 %v1692_v7  ;;  %1592 = vmatprep.subr.bf16.mxu0 %v1693_v8  ;;  %v1708_v26 = vld [vmem:[#allocation2 + $0x90] sm:$0xff]   ;;  %v1709_v27 = vld [vmem:[#allocation2 + $0x48] sm:$0xff]   ;;  %v1713_v33 = vld [vmem:[#allocation2 + $0x40] sm:$0xff]  }
  0x25   :  { %1614 = vmatprep.subr.bf16.mxu1 %v1694_v9  ;;  %v1710_v28 = vld [vmem:[#allocation2 + $0xc8] sm:$0xff]   ;;  %v1714_v34 = vld [vmem:[#allocation2 + $0xc0] sm:$0xff]   ;;  %v1718_v41 = vld [vmem:[#allocation2 + $0x178] sm:$0xff]  }
  0x26   :  { %v1711_v31 = vld [vmem:[#allocation2 + $0x8] sm:$0xff]   ;;  %v1715_v36 = vld [vmem:[#allocation2] sm:$0xff]   ;;  %v1719_v42 = vld [vmem:[#allocation2 + $0x1f8] sm:$0xff]  }
  0x27   :  { %1593 = vmatpush3.bf16.msra.mxu0 %v1695_v10  ;;  %v1712_v32 = vld [vmem:[#allocation2 + $0x88] sm:$0xff]   ;;  %v1716_v37 = vld [vmem:[#allocation2 + $0x80] sm:$0xff]   ;;  %v1720_v48 = vld [vmem:[#allocation2 + $0x138] sm:$0xff]  }
  0x28   :  { %1615 = vmatpush3.bf16.msra.mxu1 %v1696_v11  ;;  %1594 = vmatprep.subr.bf16.mxu0 %v1697_v12  ;;  %v49_v38 = vld [vmem:[%s1895_s0] sm:$0xff]  ;;  %v1722_v50 = vld [vmem:[#allocation2 + $0x170] sm:$0xff]   ;;  %v1721_v52 = vld [vmem:[#allocation2 + $0x1b8] sm:$0xff]  }
  0x29   :  { %1616 = vmatprep.subr.bf16.mxu1 %v1698_v13  ;;  %v60_v39 = vrot.slane %v49_v38, %v1859_v35  ;;  %v53_v40 = vcombine.high %v49_v38, %v49_v38  ;;  %v1723_v53 = vld [vmem:[#allocation2 + $0x1f0] sm:$0xff]   ;;  %v1726_v55 = vld [vmem:[#allocation2 + $0x168] sm:$0xff]   ;;  %v1730_v59 = vld [vmem:[#allocation2 + $0x160] sm:$0xff]  }
  0x2a   :  { %v1724_v54 = vld [vmem:[#allocation2 + $0x130] sm:$0xff]   ;;  %v1727_v57 = vld [vmem:[#allocation2 + $0x1e8] sm:$0xff]   ;;  %v1731_v61 = vld [vmem:[#allocation2 + $0x1e0] sm:$0xff]  }
  0x2b   :  { %1595 = vmatpush3.bf16.msra.mxu0 %v1699_v14  ;;  %v68_v43 = vcombine.high %v60_v39, %v60_v39  ;;  %v67_v44 = vrot.slane %v53_v40, %v1859_v35  ;;  %v95_v45 = vpack.c.bf16 %v60_v39, %v60_v39  ;;  %v1725_v56 = vld [vmem:[#allocation2 + $0x1b0] sm:$0xff]   ;;  %v1728_v58 = vld [vmem:[#allocation2 + $0x128] sm:$0xff]   ;;  %v1732_v62 = vld [vmem:[#allocation2 + $0x120] sm:$0xff]  }
  0x2c   :  { %1617 = vmatpush3.bf16.msra.mxu1 %v1700_v15  ;;  %1596 = vmatprep.subr.bf16.mxu0 %v1701_v16  ;;  %v1729_v60 = vld [vmem:[#allocation2 + $0x1a8] sm:$0xff]   ;;  %v1734_v63 = vld [vmem:[#allocation2 + $0x158] sm:$0xff]   ;;  %v1733_v0 = vld [vmem:[#allocation2 + $0x1a0] sm:$0xff]  }
  0x2d   :  { %1618 = vmatprep.subr.bf16.mxu1 %v1702_v17  ;;  %v96_v46 = vpack.c.bf16 %v68_v43, %v68_v43  ;;  %v69_v47 = vcombine.high %v67_v44, %v67_v44  ;;  %v97_v49 = vpack.c.bf16 %v67_v44, %v67_v44  ;;  %v1735_v1 = vld [vmem:[#allocation2 + $0x1d8] sm:$0xff]   ;;  %v1738_v3 = vld [vmem:[#allocation2 + $0x150] sm:$0xff]   ;;  %v1742_v7 = vld [vmem:[#allocation2 + $0x148] sm:$0xff]  }
  0x2e   :  { %v1736_v2 = vld [vmem:[#allocation2 + $0x118] sm:$0xff]   ;;  %v1739_v5 = vld [vmem:[#allocation2 + $0x1d0] sm:$0xff]   ;;  %v1743_v9 = vld [vmem:[#allocation2 + $0x1c8] sm:$0xff]  }
  0x2f   :  { %1597 = vmatpush3.bf16.msra.mxu0 %v1703_v18  ;;  %654 = vmatprep.mubr.bf16.mxu0 %v96_v46  ;;  %v98_v51 = vpack.c.bf16 %v69_v47, %v69_v47  ;;  %v1737_v4 = vld [vmem:[#allocation2 + $0x198] sm:$0xff]   ;;  %v1740_v6 = vld [vmem:[#allocation2 + $0x110] sm:$0xff]   ;;  %v1744_v10 = vld [vmem:[#allocation2 + $0x108] sm:$0xff]  }
  0x30   :  { %1619 = vmatpush3.bf16.msra.mxu1 %v1704_v19  ;;  %1598 = vmatprep.subr.bf16.mxu0 %v1705_v20  ;;  %v1741_v8 = vld [vmem:[#allocation2 + $0x190] sm:$0xff]   ;;  %v1746_v11 = vld [vmem:[#allocation2 + $0x140] sm:$0xff]   ;;  %v1745_v12 = vld [vmem:[#allocation2 + $0x188] sm:$0xff]  }
  0x31   :  { %1620 = vmatprep.subr.bf16.mxu1 %v1706_v21  ;;  %694 = vmatprep.mubr.bf16.mxu1 %v98_v51  ;;  %v1747_v13 = vld [vmem:[#allocation2 + $0x1c0] sm:$0xff]   ;;  %v50_v14 = vld [vmem:[%s1895_s0 + $0x8] sm:$0xff] }
  0x32   :  { %v1748_v15 = vld [vmem:[#allocation2 + $0x100] sm:$0xff]   ;;  %v77_v16 = vrot.slane %v50_v14, %v1859_v35  ;;  %v70_v17 = vcombine.high %v50_v14, %v50_v14  ;;  %v833_v38 = vld [vmem:[#allocation4 + $0x188] sm:$0xff] }
  0x33   :  { %1599 = vmatpush3.bf16.msra.mxu0 %v1707_v25  ;;  %v1749_v18 = vld [vmem:[#allocation2 + $0x180] sm:$0xff]   ;;  %v837_v39 = vld [vmem:[#allocation4 + $0x1a8] sm:$0xff] }
  0x34   :  { %1621 = vmatpush3.bf16.msra.mxu1 %v1708_v26  ;;  %1600 = vmatprep.subr.bf16.mxu0 %v1709_v27  ;;  %v85_v19 = vcombine.high %v77_v16, %v77_v16  ;;  %v84_v20 = vrot.slane %v70_v17, %v1859_v35  ;;  %v99_v21 = vpack.c.bf16 %v77_v16, %v77_v16  ;;  %v840_v26 = vld [vmem:[#allocation4 + $0x1c0] sm:$0xff]  ;;  %v825_v43 = vld [vmem:[#allocation4 + $0x148] sm:$0xff] }
  0x35   :  { %1622 = vmatprep.subr.bf16.mxu1 %v1710_v28  ;;  %v844_v27 = vld [vmem:[#allocation4 + $0x1e0] sm:$0xff]  ;;  %v841_v28 = vld [vmem:[#allocation4 + $0x1c8] sm:$0xff]  ;;  %v1570_v46 = vcombine.low %v833_v38, %v837_v39 }
  0x36   :  { %v100_v22 = vpack.c.bf16 %v85_v19, %v85_v19  ;;  %v86_v23 = vcombine.high %v84_v20, %v84_v20  ;;  %v101_v24 = vpack.c.bf16 %v84_v20, %v84_v20  ;;  %v1576_v29 = vcombine.low %v840_v26, %v844_v27  ;;  %v824_v40 = vld [vmem:[#allocation4 + $0x140] sm:$0xff]  ;;  %v829_v44 = vld [vmem:[#allocation4 + $0x168] sm:$0xff] }
  0x37   :  { %1601 = vmatpush3.bf16.msra.mxu0 %v1711_v31  ;;  %v1577_v31 = vcombine.high %v840_v26, %v844_v27  ;;  %v817_v51 = vld [vmem:[#allocation4 + $0x108] sm:$0xff]  ;;  %v784_v19 = vld [vmem:[#allocation4] sm:$0xff]  ;;  %v842_v27 = vld [vmem:[#allocation4 + $0x1d0] sm:$0xff] }
  0x38   :  { %1623 = vmatpush3.bf16.msra.mxu1 %v1712_v32  ;;  %1602 = vmatprep.subr.bf16.mxu0 %v1713_v33  ;;  %v102_v25 = vpack.c.bf16 %v86_v23, %v86_v23  ;;  %v845_v32 = vld [vmem:[#allocation4 + $0x1e8] sm:$0xff]  ;;  %v832_v33 = vld [vmem:[#allocation4 + $0x180] sm:$0xff] }
  0x39   :  { %1624 = vmatprep.subr.bf16.mxu1 %v1714_v34  ;;  %v836_v34 = vld [vmem:[#allocation4 + $0x1a0] sm:$0xff]  ;;  %v1578_v35 = vcombine.low %v841_v28, %v845_v32  ;;  %v789_v23 = vld [vmem:[#allocation4 + $0x28] sm:$0xff] }
  0x3a   :  { %v788_v20 = vld [vmem:[#allocation4 + $0x20] sm:$0xff] }
  0x3b   :  { %1603 = vmatpush3.bf16.msra.mxu0 %v1715_v36  ;;  %v1579_v36 = vcombine.high %v841_v28, %v845_v32  ;;  %v846_v28 = vld [vmem:[#allocation4 + $0x1f0] sm:$0xff] }
  0x3c   :  { %1625 = vmatpush3.bf16.msra.mxu1 %v1716_v37  ;;  %1632 = vmatprep.subr.bf16.mxu0 %v1718_v41  ;;  %v1569_v37 = vcombine.high %v832_v33, %v836_v34  ;;  %v1571_v41 = vcombine.high %v833_v38, %v837_v39  ;;  %v1580_v32 = vcombine.low %v842_v27, %v846_v28 }
  0x3d   :  { %1654 = vmatprep.subr.bf16.mxu1 %v1719_v42  ;;  %v828_v42 = vld [vmem:[#allocation4 + $0x160] sm:$0xff] }
  0x3e   :  { %655 = vmatmul.mubr.bf16.vlgmr.msra.gmra.mxu0 %v95_v45  ;;  %v1568_v45 = vcombine.low %v832_v33, %v836_v34  ;;  %v1561_v47 = vcombine.high %v824_v40, %v828_v42  ;;  %v1581_v33 = vcombine.high %v842_v27, %v846_v28  ;;  %v847_v34 = vld [vmem:[#allocation4 + $0x1f8] sm:$0xff] }
  0x3f   :  { %1633 = vmatpush3.bf16.msra.mxu0 %v1720_v48  ;;  %695 = vmatmul.mubr.bf16.vlgmr.msra.gmra.mxu1 %v97_v49  ;;  %v1563_v48 = vcombine.high %v825_v43, %v829_v44  ;;  %v816_v49 = vld [vmem:[#allocation4 + $0x100] sm:$0xff] }
  0x40   :  { %1634 = vmatprep.subr.bf16.mxu0 %v1722_v50  ;;  %1655 = vmatpush3.bf16.msra.mxu1 %v1721_v52  ;;  %v820_v50 = vld [vmem:[#allocation4 + $0x120] sm:$0xff]  ;;  %v821_v52 = vld [vmem:[#allocation4 + $0x128] sm:$0xff] }
  0x41   :  { %1656 = vmatprep.subr.bf16.mxu1 %v1723_v53  ;;  %734 = vmatprep.mubr.bf16.mxu0 %v100_v22  ;;  %v1560_v53 = vcombine.low %v824_v40, %v828_v42  ;;  %v1521_v22 = vcombine.high %v784_v19, %v788_v20 }
  0x42   :  { %774 = vmatprep.mubr.bf16.mxu1 %v102_v25 }
  0x43   :  { %1635 = vmatpush3.bf16.msra.mxu0 %v1724_v54  ;;  %v1562_v54 = vcombine.low %v825_v43, %v829_v44 }
  0x44   :  { %1636 = vmatprep.subr.bf16.mxu0 %v1726_v55  ;;  %1657 = vmatpush3.bf16.msra.mxu1 %v1725_v56  ;;  %v1553_v55 = vcombine.high %v816_v49, %v820_v50  ;;  %v1555_v56 = vcombine.high %v817_v51, %v821_v52 }
  0x45   :  { %1658 = vmatprep.subr.bf16.mxu1 %v1727_v57  ;;  %v808_v57 = vld [vmem:[#allocation4 + $0xc0] sm:$0xff] }
  0x47   :  { %1637 = vmatpush3.bf16.msra.mxu0 %v1728_v58  ;;  %v812_v58 = vld [vmem:[#allocation4 + $0xe0] sm:$0xff] }
  0x48   :  { %1638 = vmatprep.subr.bf16.mxu0 %v1730_v59  ;;  %1659 = vmatpush3.bf16.msra.mxu1 %v1729_v60  ;;  %v809_v59 = vld [vmem:[#allocation4 + $0xc8] sm:$0xff] }
  0x49   :  { %1660 = vmatprep.subr.bf16.mxu1 %v1731_v61  ;;  %v813_v60 = vld [vmem:[#allocation4 + $0xe8] sm:$0xff]  ;;  %v1552_v61 = vcombine.low %v816_v49, %v820_v50 }
  0x4b   :  { %1639 = vmatpush3.bf16.msra.mxu0 %v1732_v62  ;;  %v1554_v62 = vcombine.low %v817_v51, %v821_v52 }
  0x4c   :  { %1640 = vmatprep.subr.bf16.mxu0 %v1734_v63  ;;  %1661 = vmatpush3.bf16.msra.mxu1 %v1733_v0  ;;  %v1545_v63 = vcombine.high %v808_v57, %v812_v58  ;;  %v1547_v0 = vcombine.high %v809_v59, %v813_v60 }
  0x4d   :  { %1662 = vmatprep.subr.bf16.mxu1 %v1735_v1  ;;  %v1544_v1 = vcombine.low %v808_v57, %v812_v58 }
  0x4f   :  { %1641 = vmatpush3.bf16.msra.mxu0 %v1736_v2  ;;  %v1546_v2 = vcombine.low %v809_v59, %v813_v60 }
  0x50   :  { %1642 = vmatprep.subr.bf16.mxu0 %v1738_v3  ;;  %1663 = vmatpush3.bf16.msra.mxu1 %v1737_v4  ;;  %v800_v3 = vld [vmem:[#allocation4 + $0x80] sm:$0xff] }
  0x51   :  { %1664 = vmatprep.subr.bf16.mxu1 %v1739_v5  ;;  %v804_v4 = vld [vmem:[#allocation4 + $0xa0] sm:$0xff]  ;;  %v801_v5 = vld [vmem:[#allocation4 + $0x88] sm:$0xff] }
  0x53   :  { %1643 = vmatpush3.bf16.msra.mxu0 %v1740_v6  ;;  %v1537_v6 = vcombine.high %v800_v3, %v804_v4 }
  0x54   :  { %1644 = vmatprep.subr.bf16.mxu0 %v1742_v7  ;;  %1665 = vmatpush3.bf16.msra.mxu1 %v1741_v8  ;;  %v805_v7 = vld [vmem:[#allocation4 + $0xa8] sm:$0xff]  ;;  %v1536_v8 = vcombine.low %v800_v3, %v804_v4 }
  0x55   :  { %1666 = vmatprep.subr.bf16.mxu1 %v1743_v9  ;;  %v1538_v9 = vcombine.low %v801_v5, %v805_v7 }
  0x57   :  { %1645 = vmatpush3.bf16.msra.mxu0 %v1744_v10  ;;  %v1539_v10 = vcombine.high %v801_v5, %v805_v7  ;;  %v830_v7 = vld [vmem:[#allocation4 + $0x170] sm:$0xff] }
  0x58   :  { %1646 = vmatprep.subr.bf16.mxu0 %v1746_v11  ;;  %1667 = vmatpush3.bf16.msra.mxu1 %v1745_v12  ;;  %v792_v11 = vld [vmem:[#allocation4 + $0x40] sm:$0xff] }
  0x59   :  { %1668 = vmatprep.subr.bf16.mxu1 %v1747_v13  ;;  %v796_v12 = vld [vmem:[#allocation4 + $0x60] sm:$0xff]  ;;  %v793_v13 = vld [vmem:[#allocation4 + $0x48] sm:$0xff] }
  0x5a   :  { %v1529_v14 = vcombine.high %v792_v11, %v796_v12  ;;  %v1528_v16 = vcombine.low %v792_v11, %v796_v12 }
  0x5b   :  { %1647 = vmatpush3.bf16.msra.mxu0 %v1748_v15  ;;  %v797_v15 = vld [vmem:[#allocation4 + $0x68] sm:$0xff] }
  0x5c   :  { %1669 = vmatpush3.bf16.msra.mxu1 %v1749_v18  ;;  %1210 = vmatprep.subr.bf16.mxu0 %v1577_v31  ;;  %v1530_v17 = vcombine.low %v793_v13, %v797_v15  ;;  %v1531_v18 = vcombine.high %v793_v13, %v797_v15  ;;  %v1818_v31 = vmov 0   ;;  %v822_v15 = vld [vmem:[#allocation4 + $0x130] sm:$0xff] }
  0x5d   :  { %1251 = vmatprep.subr.bf16.mxu1 %v1579_v36 }
  0x5e   :  { %735 = vmatmul.mubr.bf16.vlgmr.msra.gmra.mxu0 %v99_v21  ;;  %v785_v21 = vld [vmem:[#allocation4 + $0x8] sm:$0xff] }
  0x5f   :  { %775 = vmatmul.mubr.bf16.vlgmr.msra.gmra.mxu1 %v101_v24  ;;  %1211 = vmatpush1.bf16.msra.mxu0 %v1576_v29  ;;  %v1520_v24 = vcombine.low %v784_v19, %v788_v20  ;;  %v1522_v25 = vcombine.low %v785_v21, %v789_v23  ;;  %v1523_v26 = vcombine.high %v785_v21, %v789_v23  ;;  %v843_v29 = vld [vmem:[#allocation4 + $0x1d8] sm:$0xff]  ;;  %v814_v23 = vld [vmem:[#allocation4 + $0xf0] sm:$0xff] }
  0x60   :  { %1252 = vmatpush1.bf16.msra.mxu1 %v1578_v35  ;;  %1212 = vmatprep.subr.bf16.mxu0 %v1569_v37  ;;  %v1582_v35 = vcombine.low %v843_v29, %v847_v34  ;;  %v1583_v36 = vcombine.high %v843_v29, %v847_v34  ;;  %v807_v34 = vld [vmem:[#allocation4 + $0xb8] sm:$0xff] }
  0x61   :  { %1253 = vmatprep.subr.bf16.mxu1 %v1571_v41  ;;  %1242 = vmatprep.mubr.bf16.mxu0 %v1818_v31 }
  0x62   :  { %1283 = vmatprep.mubr.bf16.mxu1 %v1818_v31 }
  0x63   :  { %1213 = vmatpush1.bf16.msra.mxu0 %v1568_v45 }
  0x64   :  { %1254 = vmatpush1.bf16.msra.mxu1 %v1570_v46  ;;  %1214 = vmatprep.subr.bf16.mxu0 %v1561_v47  ;;  %v1455_v46 = vld [vmem:[%s1897_s2] ss:$0 sm:$0xff] }
  0x65   :  { %1255 = vmatprep.subr.bf16.mxu1 %v1563_v48 }
  0x67   :  { %1215 = vmatpush1.bf16.msra.mxu0 %v1560_v53 }
  0x68   :  { %1256 = vmatpush1.bf16.msra.mxu1 %v1562_v54  ;;  %1216 = vmatprep.subr.bf16.mxu0 %v1553_v55 }
  0x69   :  { %1257 = vmatprep.subr.bf16.mxu1 %v1555_v56 }
  0x6b   :  { %1217 = vmatpush1.bf16.msra.mxu0 %v1552_v61  ;;  %v834_v61 = vld [vmem:[#allocation4 + $0x190] sm:$0xff] }
  0x6c   :  { %1258 = vmatpush1.bf16.msra.mxu1 %v1554_v62  ;;  %1218 = vmatprep.subr.bf16.mxu0 %v1545_v63  ;;  %v838_v63 = vld [vmem:[#allocation4 + $0x1b0] sm:$0xff] }
  0x6d   :  { %1259 = vmatprep.subr.bf16.mxu1 %v1547_v0  ;;  %v835_v0 = vld [vmem:[#allocation4 + $0x198] sm:$0xff]  ;;  %v1573_v4 = vcombine.high %v834_v61, %v838_v63 }
  0x6f   :  { %1219 = vmatpush1.bf16.msra.mxu0 %v1544_v1  ;;  %v839_v1 = vld [vmem:[#allocation4 + $0x1b8] sm:$0xff] }
  0x70   :  { %1260 = vmatpush1.bf16.msra.mxu1 %v1546_v2  ;;  %1220 = vmatprep.subr.bf16.mxu0 %v1537_v6  ;;  %v1575_v5 = vcombine.high %v835_v0, %v839_v1  ;;  %v826_v6 = vld [vmem:[#allocation4 + $0x150] sm:$0xff]  ;;  %v1574_v11 = vcombine.low %v835_v0, %v839_v1  ;;  %v856_v1 = vsub.s32 1, %v1856_v30 }
  0x71   :  { %1261 = vmatprep.subr.bf16.mxu1 %v1539_v10  ;;  %v1572_v10 = vcombine.low %v834_v61, %v838_v63  ;;  %v1565_v12 = vcombine.high %v826_v6, %v830_v7 }
  0x73   :  { %1221 = vmatpush1.bf16.msra.mxu0 %v1536_v8  ;;  %v827_v8 = vld [vmem:[#allocation4 + $0x158] sm:$0xff] }
  0x74   :  { %1262 = vmatpush1.bf16.msra.mxu1 %v1538_v9  ;;  %1222 = vmatprep.subr.bf16.mxu0 %v1529_v14  ;;  %v831_v9 = vld [vmem:[#allocation4 + $0x178] sm:$0xff]  ;;  %v818_v14 = vld [vmem:[#allocation4 + $0x110] sm:$0xff] }
  0x75   :  { %1263 = vmatprep.subr.bf16.mxu1 %v1531_v18  ;;  %v1567_v13 = vcombine.high %v827_v8, %v831_v9  ;;  %v1564_v18 = vcombine.low %v826_v6, %v830_v7  ;;  %v1566_v19 = vcombine.low %v827_v8, %v831_v9  ;;  %v1557_v20 = vcombine.high %v818_v14, %v822_v15 }
  0x77   :  { %1223 = vmatpush1.bf16.msra.mxu0 %v1528_v16  ;;  %v819_v16 = vld [vmem:[#allocation4 + $0x118] sm:$0xff] }
  0x78   :  { %1264 = vmatpush1.bf16.msra.mxu1 %v1530_v17  ;;  %1224 = vmatprep.subr.bf16.mxu0 %v1521_v22  ;;  %v823_v17 = vld [vmem:[#allocation4 + $0x138] sm:$0xff]  ;;  %v810_v22 = vld [vmem:[#allocation4 + $0xd0] sm:$0xff] }
  0x79   :  { %1265 = vmatprep.subr.bf16.mxu1 %v1523_v26  ;;  %v1559_v21 = vcombine.high %v819_v16, %v823_v17  ;;  %v1556_v26 = vcombine.low %v818_v14, %v822_v15  ;;  %v1558_v27 = vcombine.low %v819_v16, %v823_v17  ;;  %v1549_v28 = vcombine.high %v810_v22, %v814_v23 }
  0x7a   :  { %v872_v15 = vsub.s32 5, %v1856_v30  ;;  %v880_v16 = vsub.s32 7, %v1856_v30 }
  0x7b   :  { %1225 = vmatpush1.bf16.msra.mxu0 %v1520_v24  ;;  %v811_v24 = vld [vmem:[#allocation4 + $0xd8] sm:$0xff] }
  0x7c   :  { %1266 = vmatpush1.bf16.msra.mxu1 %v1522_v25  ;;  %1292 = vmatprep.subr.bf16.mxu0 %v1581_v33  ;;  %v815_v25 = vld [vmem:[#allocation4 + $0xf8] sm:$0xff] }
  0x7d   :  { %1333 = vmatprep.subr.bf16.mxu1 %v1583_v36  ;;  %v1551_v29 = vcombine.high %v811_v24, %v815_v25  ;;  %v803_v33 = vld [vmem:[#allocation4 + $0x98] sm:$0xff]  ;;  %v1550_v36 = vcombine.low %v811_v24, %v815_v25 }
  0xfe   :  { %v1604_v37 = vpop.f32.mrf.mxu0 }
  0xff   :  { %v1626_v38 = vpop.f32.mrf.mxu1 }
 0x100   :  { %v1605_v39 = vpop.f32.mrf.mxu0 }
 0x101   :  { %v1627_v40 = vpop.f32.mrf.mxu1  ;;  %v1606_v45 = vadd.f32 %v1605_v39, %v1604_v37  ;;  %v794_v39 = vld [vmem:[#allocation4 + $0x50] sm:$0xff] }
 0x102   :  { %v1607_v41 = vpop.f32.mrf.mxu0  ;;  %v1628_v48 = vadd.f32 %v1627_v40, %v1626_v38  ;;  %v1543_v38 = vcombine.high %v803_v33, %v807_v34  ;;  %v798_v40 = vld [vmem:[#allocation4 + $0x70] sm:$0xff] }
 0x103   :  { %v1629_v42 = vpop.f32.mrf.mxu1  ;;  %v657_v47 = vadd.f32 %v1606_v45, %v1455_v46  ;;  %v795_v41 = vld [vmem:[#allocation4 + $0x58] sm:$0xff]  ;;  %v1533_v45 = vcombine.high %v794_v39, %v798_v40 }
 0x104   :  { %v1608_v43 = vpop.f32.mrf.mxu0  ;;  %v799_v42 = vld [vmem:[#allocation4 + $0x78] sm:$0xff] }
 0x105   :  { %v1630_v44 = vpop.f32.mrf.mxu1  ;;  %v697_v52 = vadd.f32 %v1628_v48, %v657_v47  ;;  %v1535_v46 = vcombine.high %v795_v41, %v799_v42  ;;  %v786_v47 = vld [vmem:[#allocation4 + $0x10] sm:$0xff] }
 0x106   :  { %v1542_v44 = vcombine.low %v803_v33, %v807_v34  ;;  %v790_v48 = vld [vmem:[#allocation4 + $0x30] sm:$0xff]  ;;  %v1819_v33 = vmov 1966171168  }
 0x107   :  { %v1403_v34 = vunpack.c.l.s4 %v1819_v33 }
 0x11e   :  { %v1648_v49 = vpop.f32.mrf.mxu0 }
 0x11f   :  { %v1670_v50 = vpop.f32.mrf.mxu1 }
 0x120   :  { %v1649_v51 = vpop.f32.mrf.mxu0 }
 0x121   :  { %v1650_v53 = vadd.f32 %v1649_v51, %v1648_v49  ;;  %v1671_v54 = vpop.f32.mrf.mxu1  ;;  %v787_v49 = vld [vmem:[#allocation4 + $0x18] sm:$0xff]  ;;  %v1532_v51 = vcombine.low %v794_v39, %v798_v40 }
 0x122   :  { %v1651_v55 = vpop.f32.mrf.mxu0  ;;  %v1672_v57 = vadd.f32 %v1671_v54, %v1670_v50  ;;  %v791_v50 = vld [vmem:[#allocation4 + $0x38] sm:$0xff] }
 0x123   :  { %v737_v56 = vadd.f32 %v1650_v53, %v697_v52  ;;  %v1673_v58 = vpop.f32.mrf.mxu1  ;;  %v1534_v52 = vcombine.low %v795_v41, %v799_v42  ;;  %v1525_v53 = vcombine.high %v786_v47, %v790_v48  ;;  %v1527_v54 = vcombine.high %v787_v49, %v791_v50 }
 0x124   :  { %v1652_v59 = vpop.f32.mrf.mxu0  ;;  %v1524_v55 = vcombine.low %v786_v47, %v790_v48 }
 0x125   :  { %v777_v60 = vadd.f32 %v1672_v57, %v737_v56  ;;  %v1674_v62 = vpop.f32.mrf.mxu1  ;;  %v1526_v56 = vcombine.low %v787_v49, %v791_v50 }
 0x127   :  { %v782_v2 = vmax.f32 %v777_v60, 0.0 }
 0x129   :  { %v1874_v3 = vpack.c.bf16 %v782_v2, %v782_v2  ;;  %v864_v2 = vsub.s32 3, %v1856_v30 }
 0x12b   :  { %1243 = vmatmul.mubr.bf16.vlgmr.msra.gmra.mxu0 %v1874_v3  ;;  %1284 = vmatmul.mubr.bf16.vlgmr.msra.gmra.mxu1 %v1874_v3 }
 0x12c   :  { %1293 = vmatpush1.bf16.msra.mxu0 %v1580_v32  ;;  %1334 = vmatpush1.bf16.msra.mxu1 %v1582_v35  ;;  %v806_v32 = vld [vmem:[#allocation4 + $0xb0] sm:$0xff]  ;;  %v1548_v35 = vcombine.low %v810_v22, %v814_v23 }
 0x12d   :  { %1294 = vmatprep.subr.bf16.mxu0 %v1573_v4  ;;  %1335 = vmatprep.subr.bf16.mxu1 %v1575_v5  ;;  %v852_v4 = vsub.s32 0, %v1856_v30  ;;  %v848_v5 = vld [vmem:[%s1899_s4] sm:$0xff] }
 0x12e   :  { %1324 = vmatprep.mubr.bf16.mxu0 %v1818_v31  ;;  %1365 = vmatprep.mubr.bf16.mxu1 %v1818_v31  ;;  %v802_v31 = vld [vmem:[#allocation4 + $0x90] sm:$0xff]  ;;  %v857_v6 = vrot.slane %v848_v5, %v856_v1  ;;  %v865_v7 = vrot.slane %v848_v5, %v864_v2 }
 0x12f   :  { %v1541_v37 = vcombine.high %v802_v31, %v806_v32  ;;  %v1540_v43 = vcombine.low %v802_v31, %v806_v32  ;;  %v853_v8 = vrot.slane %v848_v5, %v852_v4 }
 0x130   :  { %1295 = vmatpush1.bf16.msra.mxu0 %v1572_v10  ;;  %1336 = vmatpush1.bf16.msra.mxu1 %v1574_v11  ;;  %v868_v11 = vsub.s32 4, %v1856_v30 }
 0x131   :  { %1296 = vmatprep.subr.bf16.mxu0 %v1565_v12  ;;  %1337 = vmatprep.subr.bf16.mxu1 %v1567_v13  ;;  %v876_v12 = vsub.s32 6, %v1856_v30 }
 0x134   :  { %1297 = vmatpush1.bf16.msra.mxu0 %v1564_v18  ;;  %1338 = vmatpush1.bf16.msra.mxu1 %v1566_v19  ;;  %v869_v18 = vrot.slane %v848_v5, %v868_v11  ;;  %v877_v19 = vrot.slane %v848_v5, %v876_v12 }
 0x135   :  { %1298 = vmatprep.subr.bf16.mxu0 %v1557_v20  ;;  %1339 = vmatprep.subr.bf16.mxu1 %v1559_v21  ;;  %v873_v20 = vrot.slane %v848_v5, %v872_v15  ;;  %v881_v21 = vrot.slane %v848_v5, %v880_v16 }
 0x138   :  { %1299 = vmatpush1.bf16.msra.mxu0 %v1556_v26  ;;  %1340 = vmatpush1.bf16.msra.mxu1 %v1558_v27 }
 0x139   :  { %1300 = vmatprep.subr.bf16.mxu0 %v1549_v28  ;;  %1341 = vmatprep.subr.bf16.mxu1 %v1551_v29 }
 0x13c   :  { %1301 = vmatpush1.bf16.msra.mxu0 %v1548_v35  ;;  %1342 = vmatpush1.bf16.msra.mxu1 %v1550_v36 }
 0x13d   :  { %1302 = vmatprep.subr.bf16.mxu0 %v1541_v37  ;;  %1343 = vmatprep.subr.bf16.mxu1 %v1543_v38  ;;  %v1404_v38 = vunpack.c.0.s8 %v1403_v34 }
 0x140   :  { %1303 = vmatpush1.bf16.msra.mxu0 %v1540_v43  ;;  %1344 = vmatpush1.bf16.msra.mxu1 %v1542_v44  ;;  %v1407_v43 = vsub.s32 %v1404_v38, %v1856_v30 }
 0x141   :  { %1304 = vmatprep.subr.bf16.mxu0 %v1533_v45  ;;  %1345 = vmatprep.subr.bf16.mxu1 %v1535_v46 }
 0x144   :  { %1305 = vmatpush1.bf16.msra.mxu0 %v1532_v51  ;;  %1346 = vmatpush1.bf16.msra.mxu1 %v1534_v52 }
 0x145   :  { %1306 = vmatprep.subr.bf16.mxu0 %v1525_v53  ;;  %1347 = vmatprep.subr.bf16.mxu1 %v1527_v54 }
 0x148   :  { %1307 = vmatpush1.bf16.msra.mxu0 %v1524_v55  ;;  %1348 = vmatpush1.bf16.msra.mxu1 %v1526_v56 }
 0x14b   :  { %1325 = vmatmul.mubr.bf16.vlgmr.msra.gmra.mxu0 %v1874_v3  ;;  %1366 = vmatmul.mubr.bf16.vlgmr.msra.gmra.mxu1 %v1874_v3  ;;  %v860_v3 = vsub.s32 2, %v1856_v30 }
 0x14d   :  { %v861_v9 = vrot.slane %v848_v5, %v860_v3 }
 0x1eb   :  { %v1244_v57 = vpop.f32.mrf.mxu0  ;;  %v1285_v58 = vpop.f32.mrf.mxu1 }
 0x1ec   :  { %v1245_v14 = vadd.f32 %v1244_v57, %v853_v8  ;;  %v1286_v17 = vadd.f32 %v1285_v58, %v861_v9 }
 0x1ed   :  { %v1246_v59 = vpop.f32.mrf.mxu0  ;;  %v1287_v60 = vpop.f32.mrf.mxu1 }
 0x1ee   :  { %v1247_v10 = vadd.f32 %v1246_v59, %v857_v6  ;;  %v1288_v13 = vadd.f32 %v1287_v60, %v865_v7 }
 0x1ef   :  { %v1248_v61 = vpop.f32.mrf.mxu0  ;;  %v1289_v62 = vpop.f32.mrf.mxu1 }
 0x1f0   :  { %1751 = vtanh.f32 %v1247_v10 }
 0x1f1   :  { %v1249_v63 = vpop.f32.mrf.mxu0  ;;  %v1290_v0 = vpop.f32.mrf.mxu1  ;;  %1753 = vtanh.f32 %v1288_v13 }
 0x1f2   :  { %1755 = vtanh.f32 %v1245_v14 }
 0x1f3   :  { %1757 = vtanh.f32 %v1286_v17 }
 0x1fd   :  { %v1752_v37 = vpop.eup %1751 }
 0x1fe   :  { %v1754_v39 = vpop.eup %1753 }
 0x1ff   :  { %v1756_v40 = vpop.eup %1755 }
 0x200   :  { %v1758_v41 = vpop.eup %1757  ;;  %v1584_v42 = vpack.c.bf16 %v1752_v37, %v1756_v40 }
 0x201   :  { %v1585_v44 = vpack.c.bf16 %v1754_v39, %v1758_v41 }
 0x202   :  { %v1408_v48 = vrot.slane %v1584_v42, %v1407_v43 }
 0x203   :  { %v1415_v49 = vrot.slane %v1585_v44, %v1407_v43 }
 0x205   :  { %v1430_v54 = vcombine.low %v1408_v48, %v1415_v49 }
 0x207   :  { %v1438_v57 = vrot.slane %v1430_v54, %v1407_v43 }
 0x20b   :  { %v1326_v22 = vpop.f32.mrf.mxu0  ;;  %v1367_v23 = vpop.f32.mrf.mxu1 }
 0x20c   :  { %v1327_v24 = vadd.f32 %v1326_v22, %v869_v18  ;;  %v1368_v25 = vadd.f32 %v1367_v23, %v877_v19 }
 0x20d   :  { %v1328_v26 = vpop.f32.mrf.mxu0  ;;  %v1369_v27 = vpop.f32.mrf.mxu1 }
 0x20e   :  { %1759 = vtanh.f32 %v1327_v24  ;;  %v1329_v28 = vadd.f32 %v1328_v26, %v873_v20  ;;  %v1370_v29 = vadd.f32 %v1369_v27, %v881_v21 }
 0x20f   :  { %1761 = vtanh.f32 %v1368_v25  ;;  %v1330_v31 = vpop.f32.mrf.mxu0  ;;  %v1371_v32 = vpop.f32.mrf.mxu1 }
 0x210   :  { %1763 = vtanh.f32 %v1329_v28 }
 0x211   :  { %1765 = vtanh.f32 %v1370_v29  ;;  %v1331_v35 = vpop.f32.mrf.mxu0  ;;  %v1372_v36 = vpop.f32.mrf.mxu1 }
 0x21b   :  { %v1760_v45 = vpop.eup %1759 }
 0x21c   :  { %v1762_v46 = vpop.eup %1761 }
 0x21d   :  { %v1764_v47 = vpop.eup %1763 }
 0x21e   :  { %v1766_v50 = vpop.eup %1765  ;;  %v1586_v51 = vpack.c.bf16 %v1764_v47, %v1760_v45 }
 0x21f   :  { %v1587_v52 = vpack.c.bf16 %v1766_v50, %v1762_v46 }
 0x220   :  { %v1422_v53 = vrot.slane %v1586_v51, %v1407_v43 }
 0x221   :  { %v1429_v55 = vrot.slane %v1587_v52, %v1407_v43 }
 0x223   :  { %v1431_v56 = vcombine.low %v1422_v53, %v1429_v55 }
 0x225   :  { %v1445_v58 = vrot.slane %v1431_v56, %v1407_v43 }
 0x227   :  { %v1446_v59 = vcombine.low %v1438_v57, %v1445_v58 }
 0x229   :  { %1448 = vst [vmem:[%s1900_s5] sm:$0xff] %v1446_v59 }
 0x22a   :  { %1453 = vsyncpa [#allocation3], 1 }
 0x22b   :  { %1454 = vsyncpa [#allocation5], 1 }

</bundles_post_ra>
